<compile_context>
chip_gen: v5e
topology: v5e:2x2
jax: 0.10.0
libtpu: 0.0.40
codegen_flags: <defaults>
</compile_context>

<pallas_src>
import functools
import math

import jax
import jax.numpy as jnp
from jax.experimental import pallas as pl
from jax.experimental.pallas import tpu as pltpu

LN_EPS = 1e-5                       # nn.LayerNorm default
_VMEM_LIMIT = 48 * 1024 * 1024      # explicit scoped-VMEM request (< v7x 64 MiB)
_VMEM_BUDGET = 24 * 1024 * 1024     # target per-step working set for tiling


def _round_up(v, m):
    return (v + m - 1) // m * m


def _patch_merge_kernel(x_ref, wa_ref, wb_ref, b_ref, o_ref):
    # x_ref:  (t, 2, Wo, 2C)  axis 1 = h-parity, channels = [w-even C | w-odd C]
    # wa_ref: (2C, C2p)       folded weight rows matching the h-even slab order
    # wb_ref: (2C, C2p)       folded weight rows matching the h-odd  slab order
    # b_ref:  (1, C2p)        beta @ W (fp32)
    # o_ref:  (t*Wo, C2p)
    t, _, wo, c2 = x_ref.shape
    rows = t * wo

    xa = x_ref[:, 0, :, :].reshape(rows, c2).astype(jnp.float32)  # h-even slab
    xb = x_ref[:, 1, :, :].reshape(rows, c2).astype(jnp.float32)  # h-odd  slab

    # LayerNorm over the (virtual) 4C feature axis = union of the two 2C slabs.
    inv_n = 1.0 / (2.0 * c2)
    mean = (jnp.sum(xa, axis=-1, keepdims=True)
            + jnp.sum(xb, axis=-1, keepdims=True)) * inv_n
    xac = xa - mean
    xbc = xb - mean
    var = (jnp.sum(xac * xac, axis=-1, keepdims=True)
           + jnp.sum(xbc * xbc, axis=-1, keepdims=True)) * inv_n
    rstd = jax.lax.rsqrt(var + LN_EPS)

    # Affine is folded into wa/wb/bias offline; cast to the matmul dtype
    # (bf16 by default) and accumulate in fp32 on the MXU.
    ya = (xac * rstd).astype(wa_ref.dtype)
    yb = (xbc * rstd).astype(wb_ref.dtype)
    acc = jnp.dot(ya, wa_ref[...], preferred_element_type=jnp.float32)
    acc = acc + jnp.dot(yb, wb_ref[...], preferred_element_type=jnp.float32)
    acc = acc + b_ref[...].astype(jnp.float32)

    o_ref[...] = acc.astype(o_ref.dtype)


def _choose_row_tile(bho, wo, c2, c2p, x_bytes, w_bytes, rows_per_step):
    """Pick t (merged rows along B*Ho per grid step); t is BHo or a multiple of 8."""
    def est(tt):
        rows = tt * wo
        io = (2 * 2 * rows * c2 * x_bytes       # input block (both parities), 2x buffered
              + 2 * rows * c2p * x_bytes)        # output block, 2x buffered
        temps = rows * (2 * c2 * 4 * 2           # fp32 slabs + centered copies
                        + c2p * 4)               # fp32 accumulator
        weights = 2 * (2 * c2 * c2p * w_bytes) + c2p * 4
        return io + temps + weights

    t_target = max(1, rows_per_step // max(wo, 1))
    t = bho if t_target >= bho else max(8, (t_target // 8) * 8)
    while t > 8 and est(t) > _VMEM_BUDGET:
        nt = max(8, ((t // 2) // 8) * 8)
        if nt == t:
            break
        t = nt
    return min(t, bho) if t >= bho else t


@functools.partial(jax.jit, static_argnames=("matmul_dtype", "rows_per_step"))
def patch_merge(x, gamma, beta, w_red, *,
                matmul_dtype=jnp.bfloat16, rows_per_step=1024):
    """PatchMerge forward.

    x:      (B, H, W, C)  channels-last, H and W even
    gamma:  (4C,)         LayerNorm weight
    beta:   (4C,)         LayerNorm bias
    w_red:  (4C, 2C)      reduction weight (transposed vs torch Linear), y = ln(x4) @ w_red
    returns (B, H//2, W//2, 2C)
    """
    B, H, W, C = x.shape
    assert H % 2 == 0 and W % 2 == 0, "H and W must be even"
    Ho, Wo = H // 2, W // 2
    C2, C4 = 2 * C, 4 * C
    assert gamma.shape == (C4,) and beta.shape == (C4,) and w_red.shape == (C4, C2)

    C2p = _round_up(C2, 128)     # lane-dense output width
    BHo = B * Ho
    M = BHo * Wo

    # Free reshape: w-parity -> channel axis, h-parity -> its own axis.
    #   xr[b*Ho+ho, hp, wo, :C]  = x[b, 2*ho+hp, 2*wo,   :]
    #   xr[b*Ho+ho, hp, wo, C:]  = x[b, 2*ho+hp, 2*wo+1, :]
    xr = x.reshape(BHo, 2, Wo, C2)

    # Fold the LayerNorm affine into the reduction weight (fp32, offline).
    g32 = gamma.astype(jnp.float32)
    b32 = beta.astype(jnp.float32)
    w32 = w_red.astype(jnp.float32)
    wf = g32[:, None] * w32              # (4C, 2C)
    bias = b32 @ w32                     # (2C,)
    # torch concat order along 4C: [(h0,w0), (h1,w0), (h0,w1), (h1,w1)]
    wa = jnp.concatenate([wf[0:C], wf[2 * C:3 * C]], axis=0)      # h-parity 0 rows
    wb = jnp.concatenate([wf[C:2 * C], wf[3 * C:4 * C]], axis=0)  # h-parity 1 rows
    if C2p != C2:
        wa = jnp.pad(wa, ((0, 0), (0, C2p - C2)))
        wb = jnp.pad(wb, ((0, 0), (0, C2p - C2)))
        bias = jnp.pad(bias, ((0, C2p - C2),))
    wa = wa.astype(matmul_dtype)
    wb = wb.astype(matmul_dtype)
    bias = bias.reshape(1, C2p).astype(jnp.float32)

    t = _choose_row_tile(BHo, Wo, C2, C2p,
                         x.dtype.itemsize, jnp.dtype(matmul_dtype).itemsize,
                         rows_per_step)

    out = pl.pallas_call(
        _patch_merge_kernel,
        out_shape=jax.ShapeDtypeStruct((M, C2p), x.dtype),
        grid_spec=pltpu.PrefetchScalarGridSpec(
            num_scalar_prefetch=0,
            grid=(pl.cdiv(BHo, t),),
            in_specs=[
                pl.BlockSpec((t, 2, Wo, C2), lambda i: (i, 0, 0, 0)),  # contiguous block
                pl.BlockSpec((C2, C2p), lambda i: (0, 0)),
                pl.BlockSpec((C2, C2p), lambda i: (0, 0)),
                pl.BlockSpec((1, C2p), lambda i: (0, 0)),
            ],
            out_specs=pl.BlockSpec((t * Wo, C2p), lambda i: (i, 0)),
        ),
        compiler_params=pltpu.CompilerParams(
            dimension_semantics=("parallel",),
            vmem_limit_bytes=_VMEM_LIMIT,
        ),
    )(xr, wa, wb, bias)

    out = out.reshape(B, Ho, Wo, C2p)
    if C2p != C2:
        out = out[..., :C2]
    return out


def _reference(x, gamma, beta, w_red):
    """Pure-JAX fp32 reference matching the PyTorch forward."""
    x = x.astype(jnp.float32)
    x0 = x[:, 0::2, 0::2, :]
    x1 = x[:, 1::2, 0::2, :]
    x2 = x[:, 0::2, 1::2, :]
    x3 = x[:, 1::2, 1::2, :]
    x4 = jnp.concatenate([x0, x1, x2, x3], axis=-1)
    mean = jnp.mean(x4, axis=-1, keepdims=True)
    var = jnp.mean((x4 - mean) ** 2, axis=-1, keepdims=True)
    xn = (x4 - mean) / jnp.sqrt(var + LN_EPS)
    y = xn * gamma.astype(jnp.float32) + beta.astype(jnp.float32)
    return y @ w_red.astype(jnp.float32)


if __name__ == "__main__":
    key = jax.random.PRNGKey(0)
    k1, k2, k3, k4, k5 = jax.random.split(key, 5)

    # --- Test 1: fp32 path, C=32 (2C=64 -> padded lane-dense output) --------
    B, H, W, C = 2, 16, 16, 32
    C4, C2 = 4 * C, 2 * C
    x = jax.random.normal(k1, (B, H, W, C), dtype=jnp.float32)
    gamma = 1.0 + 0.1 * jax.random.normal(k2, (C4,), dtype=jnp.float32)
    beta = 0.1 * jax.random.normal(k3, (C4,), dtype=jnp.float32)
    w_red = jax.random.normal(k4, (C4, C2), dtype=jnp.float32) / math.sqrt(C4)

    out = jax.block_until_ready(
        patch_merge(x, gamma, beta, w_red, matmul_dtype=jnp.float32))
    ref = _reference(x, gamma, beta, w_red)
    assert out.shape == (B, H // 2, W // 2, C2), out.shape
    err = float(jnp.max(jnp.abs(out - ref)))
    assert err < 1e-4, f"fp32 path max abs err {err}"

    # --- Test 2: bf16 activations + bf16 MXU matmul, C=64 (2C=128), grid>1 --
    B, H, W, C = 2, 64, 32, 64
    C4, C2 = 4 * C, 2 * C
    x2 = jax.random.normal(k5, (B, H, W, C), dtype=jnp.float32).astype(jnp.bfloat16)
    k6, k7, k8 = jax.random.split(k1, 3)
    gamma2 = 1.0 + 0.1 * jax.random.normal(k6, (C4,), dtype=jnp.float32)
    beta2 = 0.1 * jax.random.normal(k7, (C4,), dtype=jnp.float32)
    w_red2 = jax.random.normal(k8, (C4, C2), dtype=jnp.float32) / math.sqrt(C4)

    out2 = jax.block_until_ready(
        patch_merge(x2, gamma2, beta2, w_red2,
                    matmul_dtype=jnp.bfloat16, rows_per_step=256))
    ref2 = _reference(x2, gamma2, beta2, w_red2)
    assert out2.shape == (B, H // 2, W // 2, C2), out2.shape
    err2 = float(jnp.max(jnp.abs(out2.astype(jnp.float32) - ref2)))
    assert err2 < 5e-2, f"bf16 path max abs err {err2}"

    print("KERNEL_OK")
</pallas_src>

<mosaic_0001>
module attributes {stable_mosaic.version = 11 : i64} {
  func.func @_patch_merge_kernel(%arg0: i32, %arg1: memref<16x2x8x64xf32, #tpu.memory_space<vmem>>, %arg2: memref<64x128xf32, #tpu.memory_space<vmem>>, %arg3: memref<64x128xf32, #tpu.memory_space<vmem>>, %arg4: memref<1x128xf32, #tpu.memory_space<vmem>>, %arg5: memref<128x128xf32, #tpu.memory_space<vmem>>) attributes {dimension_semantics = [#tpu.dimension_semantics<parallel>], iteration_bounds = array<i64: 1>, scalar_prefetch = 0 : i64, scratch_operands = 0 : i64, tpu.core_type = #tpu.core_type<tc>, window_params = [{transform_indices = @transform_0, window_bounds = array<i64: 16, 2, 8, 64>}, {pipeline_mode = #tpu.pipeline_mode<synchronous>, transform_indices = @transform_1, window_bounds = array<i64: 64, 128>}, {pipeline_mode = #tpu.pipeline_mode<synchronous>, transform_indices = @transform_2, window_bounds = array<i64: 64, 128>}, {pipeline_mode = #tpu.pipeline_mode<synchronous>, transform_indices = @transform_3, window_bounds = array<i64: 1, 128>}, {transform_indices = @transform_4, window_bounds = array<i64: 128, 128>}]} {
    %c0 = arith.constant 0 : index
    %c0_0 = arith.constant 0 : index
    %c0_1 = arith.constant 0 : index
    %c0_2 = arith.constant 0 : index
    %0 = vector.load %arg1[%c0, %c0_0, %c0_1, %c0_2] : memref<16x2x8x64xf32, #tpu.memory_space<vmem>>, vector<16x1x8x64xf32>
    %1 = vector.shape_cast %0 : vector<16x1x8x64xf32> to vector<16x8x64xf32>
    %2 = vector.shape_cast %1 : vector<16x8x64xf32> to vector<128x64xf32>
    %c0_3 = arith.constant 0 : index
    %c1 = arith.constant 1 : index
    %c0_4 = arith.constant 0 : index
    %c0_5 = arith.constant 0 : index
    %3 = vector.load %arg1[%c0_3, %c1, %c0_4, %c0_5] : memref<16x2x8x64xf32, #tpu.memory_space<vmem>>, vector<16x1x8x64xf32>
    %4 = vector.shape_cast %3 : vector<16x1x8x64xf32> to vector<16x8x64xf32>
    %5 = vector.shape_cast %4 : vector<16x8x64xf32> to vector<128x64xf32>
    %cst = arith.constant dense<0.000000e+00> : vector<128xf32>
    %6 = vector.multi_reduction <add>, %2, %cst [1] : vector<128x64xf32> to vector<128xf32>
    %7 = vector.shape_cast %6 : vector<128xf32> to vector<128x1xf32>
    %cst_6 = arith.constant dense<0.000000e+00> : vector<128xf32>
    %8 = vector.multi_reduction <add>, %5, %cst_6 [1] : vector<128x64xf32> to vector<128xf32>
    %9 = vector.shape_cast %8 : vector<128xf32> to vector<128x1xf32>
    %10 = arith.addf %7, %9 : vector<128x1xf32>
    %cst_7 = arith.constant 7.812500e-03 : f32
    %11 = vector.broadcast %cst_7 : f32 to vector<128x1xf32>
    %12 = arith.mulf %10, %11 : vector<128x1xf32>
    %13 = vector.broadcast %12 : vector<128x1xf32> to vector<128x64xf32>
    %14 = arith.subf %2, %13 : vector<128x64xf32>
    %15 = vector.broadcast %12 : vector<128x1xf32> to vector<128x64xf32>
    %16 = arith.subf %5, %15 : vector<128x64xf32>
    %17 = arith.mulf %14, %14 : vector<128x64xf32>
    %cst_8 = arith.constant dense<0.000000e+00> : vector<128xf32>
    %18 = vector.multi_reduction <add>, %17, %cst_8 [1] : vector<128x64xf32> to vector<128xf32>
    %19 = vector.shape_cast %18 : vector<128xf32> to vector<128x1xf32>
    %20 = arith.mulf %16, %16 : vector<128x64xf32>
    %cst_9 = arith.constant dense<0.000000e+00> : vector<128xf32>
    %21 = vector.multi_reduction <add>, %20, %cst_9 [1] : vector<128x64xf32> to vector<128xf32>
    %22 = vector.shape_cast %21 : vector<128xf32> to vector<128x1xf32>
    %23 = arith.addf %19, %22 : vector<128x1xf32>
    %cst_10 = arith.constant 7.812500e-03 : f32
    %24 = vector.broadcast %cst_10 : f32 to vector<128x1xf32>
    %25 = arith.mulf %23, %24 : vector<128x1xf32>
    %cst_11 = arith.constant 9.99999974E-6 : f32
    %26 = vector.broadcast %cst_11 : f32 to vector<128x1xf32>
    %27 = arith.addf %25, %26 : vector<128x1xf32>
    %28 = math.rsqrt %27 : vector<128x1xf32>
    %29 = vector.broadcast %28 : vector<128x1xf32> to vector<128x64xf32>
    %30 = arith.mulf %14, %29 : vector<128x64xf32>
    %31 = vector.broadcast %28 : vector<128x1xf32> to vector<128x64xf32>
    %32 = arith.mulf %16, %31 : vector<128x64xf32>
    %c0_12 = arith.constant 0 : index
    %c0_13 = arith.constant 0 : index
    %33 = vector.load %arg2[%c0_12, %c0_13] : memref<64x128xf32, #tpu.memory_space<vmem>>, vector<64x128xf32>
    %cst_14 = arith.constant dense<0.000000e+00> : vector<128x128xf32>
    %34 = tpu.matmul %30, %33, %cst_14 {dimension_numbers = #tpu.dot_dimension_numbers<[1], [0], [0], [1], [0, 0, 1, 1], [], []>} : vector<128x64xf32>, vector<64x128xf32>, vector<128x128xf32> -> vector<128x128xf32>
    %c0_15 = arith.constant 0 : index
    %c0_16 = arith.constant 0 : index
    %35 = vector.load %arg3[%c0_15, %c0_16] : memref<64x128xf32, #tpu.memory_space<vmem>>, vector<64x128xf32>
    %cst_17 = arith.constant dense<0.000000e+00> : vector<128x128xf32>
    %36 = tpu.matmul %32, %35, %cst_17 {dimension_numbers = #tpu.dot_dimension_numbers<[1], [0], [0], [1], [0, 0, 1, 1], [], []>} : vector<128x64xf32>, vector<64x128xf32>, vector<128x128xf32> -> vector<128x128xf32>
    %37 = arith.addf %34, %36 : vector<128x128xf32>
    %c0_18 = arith.constant 0 : index
    %c0_19 = arith.constant 0 : index
    %38 = vector.load %arg4[%c0_18, %c0_19] : memref<1x128xf32, #tpu.memory_space<vmem>>, vector<1x128xf32>
    %39 = vector.broadcast %38 : vector<1x128xf32> to vector<128x128xf32>
    %40 = arith.addf %37, %39 : vector<128x128xf32>
    %c0_20 = arith.constant 0 : index
    %c0_21 = arith.constant 0 : index
    %41 = vector.load %arg5[%c0_20, %c0_21] : memref<128x128xf32, #tpu.memory_space<vmem>>, vector<128x128xf32>
    tpu.vector_store %arg5[%c0_20, %c0_21], %40 {strides = array<i32>} : memref<128x128xf32, #tpu.memory_space<vmem>>, vector<128x128xf32>,
    return
  }
  func.func @transform_0(%arg0: i32) -> (i32, i32, i32, i32) {
    %c0_i32 = arith.constant 0 : i32
    %c0_i32_0 = arith.constant 0 : i32
    %c0_i32_1 = arith.constant 0 : i32
    %c0_i32_2 = arith.constant 0 : i32
    return %arg0, %c0_i32, %c0_i32_0, %c0_i32_1 : i32, i32, i32, i32
  }
  func.func @transform_1(%arg0: i32) -> (i32, i32) {
    %c0_i32 = arith.constant 0 : i32
    %c0_i32_0 = arith.constant 0 : i32
    %c0_i32_1 = arith.constant 0 : i32
    return %c0_i32, %c0_i32_0 : i32, i32
  }
  func.func @transform_2(%arg0: i32) -> (i32, i32) {
    %c0_i32 = arith.constant 0 : i32
    %c0_i32_0 = arith.constant 0 : i32
    %c0_i32_1 = arith.constant 0 : i32
    return %c0_i32, %c0_i32_0 : i32, i32
  }
  func.func @transform_3(%arg0: i32) -> (i32, i32) {
    %c0_i32 = arith.constant 0 : i32
    %c0_i32_0 = arith.constant 0 : i32
    %c0_i32_1 = arith.constant 0 : i32
    return %c0_i32, %c0_i32_0 : i32, i32
  }
  func.func @transform_4(%arg0: i32) -> (i32, i32) {
    %c0_i32 = arith.constant 0 : i32
    %c0_i32_0 = arith.constant 0 : i32
    return %arg0, %c0_i32 : i32, i32
  }
}

</mosaic_0001>

<bundles_post_ra>
// kernel: patch_merge.1
= control target key start
LH: loop header
LB: loop body
LE: loop exit
PB: predicated region body
PF: predicated region fallthrough
CT: control target
= control target key end

     0   :  { %vm51_vm0 = vcmask 523264   ;;  %s1632_s0 = inlined_call_operand.vmem [shape: f32[16,2,8,64], index: 0, kind: input, shape index: {}]   ;;  %s1633_s1 = inlined_call_operand.vmem [shape: f32[64,128], index: 1, kind: input, shape index: {}]   ;;  %s1634_s2 = inlined_call_operand.vmem [shape: f32[64,128], index: 2, kind: input, shape index: {}]   ;;  %s1635_s3 = inlined_call_operand.vmem [shape: f32[1,128], index: 3, kind: input, shape index: {}]   ;;  %s1636_s4 = inlined_call_operand.hbm [shape: f32[128,128], index: 4, kind: output, shape index: {}]  }
   0x1   :  { %v1033_v0 = vld [vmem:[%s1632_s0 + $0x90] sm:$0xff]  ;;  %v1038_v1 = vld [vmem:[%s1632_s0 + $0x80] sm:$0xff]  ;;  %v1054_v6 = vld [vmem:[%s1632_s0 + $0x98] sm:$0xff] }
   0x2   :  { %v1043_v2 = vld [vmem:[%s1632_s0] sm:$0xff]  ;;  %v79_v3 = vsel %vm51_vm0, %v1033_v0, 0.0  ;;  %v76_v4 = vsel %vm51_vm0, %v1038_v1, 0.0  ;;  %v1059_v7 = vld [vmem:[%s1632_s0 + $0x88] sm:$0xff] }
   0x3   :  { %v52_v5 = vsel %vm51_vm0, %v1043_v2, 0.0  ;;  %80 = vadd.xlane.f32.xlu2 %v79_v3  ;;  %77 = vadd.xlane.f32.xlu0 %v76_v4  ;;  %v1064_v8 = vld [vmem:[%s1632_s0 + $0x8] sm:$0xff] }
   0x4   :  { %53 = vadd.xlane.f32.xlu1 %v52_v5 }
   0x5   :  { %9 = vsyncpa [#allocation3], 0  ;;  %v127_v9 = vsel %vm51_vm0, %v1054_v6, 0.0  ;;  %v124_v10 = vsel %vm51_vm0, %v1059_v7, 0.0  ;;  %v100_v11 = vsel %vm51_vm0, %v1064_v8, 0.0  ;;  %v1075_v12 = vld [vmem:[%s1632_s0 + $0x10] sm:$0xff] }
   0x6   :  { %v1080_v13 = vld [vmem:[%s1632_s0 + $0xa0] sm:$0xff]  ;;  %v1085_v14 = vld [vmem:[%s1632_s0 + $0x18] sm:$0xff]  ;;  %v55_v15 = vsel %vm51_vm0, %v1075_v12, 0.0  ;;  %v1096_v18 = vld [vmem:[%s1632_s0 + $0xa8] sm:$0xff]  ;;  %s864_s8 = sshll.u32 %s1636_s4, 4  ;;  %s1003_s9 = smov 128   ;;  %s865_s8 = int_to_ptr.hbm [resolvable:$true] %s864_s8 }
   0x7   :  { %v82_v16 = vsel %vm51_vm0, %v1080_v13, 0.0  ;;  %v103_v17 = vsel %vm51_vm0, %v1085_v14, 0.0  ;;  %v1101_v19 = vld [vmem:[%s1632_s0 + $0x28] sm:$0xff]  ;;  %v1106_v20 = vld [vmem:[%s1632_s0 + $0x20] sm:$0xff]  ;;  %v130_v21 = vsel %vm51_vm0, %v1096_v18, 0.0  ;;  %v1117_v24 = vld [vmem:[%s1632_s0 + $0xb0] sm:$0xff] }
   0x8   :  { %v106_v22 = vsel %vm51_vm0, %v1101_v19, 0.0  ;;  %v58_v23 = vsel %vm51_vm0, %v1106_v20, 0.0  ;;  %v1122_v25 = vld [vmem:[%s1632_s0 + $0x30] sm:$0xff]  ;;  %v1127_v26 = vld [vmem:[%s1632_s0 + $0xb8] sm:$0xff]  ;;  %v85_v27 = vsel %vm51_vm0, %v1117_v24, 0.0  ;;  %v1143_v31 = vld [vmem:[%s1632_s0 + $0xc8] sm:$0xff] }
   0x9   :  { %v61_v28 = vsel %vm51_vm0, %v1122_v25, 0.0  ;;  %v133_v29 = vsel %vm51_vm0, %v1127_v26, 0.0  ;;  %v1138_v30 = vld [vmem:[%s1632_s0 + $0x38] sm:$0xff]  ;;  %v1148_v32 = vld [vmem:[%s1632_s0 + $0xc0] sm:$0xff]  ;;  %v136_v34 = vsel %vm51_vm0, %v1143_v31, 0.0  ;;  %v1164_v37 = vld [vmem:[%s1632_s0 + $0xd0] sm:$0xff] }
   0xa   :  { %v109_v33 = vsel %vm51_vm0, %v1138_v30, 0.0  ;;  %v88_v35 = vsel %vm51_vm0, %v1148_v32, 0.0  ;;  %v1159_v36 = vld [vmem:[%s1632_s0 + $0x40] sm:$0xff]  ;;  %v1169_v38 = vld [vmem:[%s1632_s0 + $0x48] sm:$0xff]  ;;  %v91_v40 = vsel %vm51_vm0, %v1164_v37, 0.0  ;;  %v1180_v42 = vld [vmem:[%s1632_s0 + $0xd8] sm:$0xff] }
   0xb   :  { %128 = vadd.xlane.f32.xlu2 %v127_v9  ;;  %125 = vadd.xlane.f32.xlu0 %v124_v10  ;;  %v64_v39 = vsel %vm51_vm0, %v1159_v36, 0.0  ;;  %v112_v41 = vsel %vm51_vm0, %v1169_v38, 0.0  ;;  %v1185_v43 = vld [vmem:[%s1632_s0 + $0x58] sm:$0xff]  ;;  %v1190_v44 = vld [vmem:[%s1632_s0 + $0x50] sm:$0xff]  ;;  %v139_v45 = vsel %vm51_vm0, %v1180_v42, 0.0  ;;  %v1201_v48 = vld [vmem:[%s1632_s0 + $0xe0] sm:$0xff] }
   0xc   :  { %101 = vadd.xlane.f32.xlu1 %v100_v11  ;;  %v115_v46 = vsel %vm51_vm0, %v1185_v43, 0.0  ;;  %v67_v47 = vsel %vm51_vm0, %v1190_v44, 0.0  ;;  %v1206_v49 = vld [vmem:[%s1632_s0 + $0x68] sm:$0xff]  ;;  %v94_v51 = vsel %vm51_vm0, %v1201_v48, 0.0  ;;  %v1222_v54 = vld [vmem:[%s1632_s0 + $0xf0] sm:$0xff]  ;;  %v1227_v55 = vld [vmem:[%s1632_s0 + $0xf8] sm:$0xff] }
   0xd   :  { %v1211_v50 = vld [vmem:[%s1632_s0 + $0xe8] sm:$0xff]  ;;  %v118_v52 = vsel %vm51_vm0, %v1206_v49, 0.0  ;;  %v1232_v56 = vld [vmem:[%s1632_s0 + $0x60] sm:$0xff]  ;;  %v97_v57 = vsel %vm51_vm0, %v1222_v54, 0.0  ;;  %v145_v58 = vsel %vm51_vm0, %v1227_v55, 0.0  ;;  %v1243_v60 = vld [vmem:[%s1632_s0 + $0x70] sm:$0xff] }
   0xe   :  { %v142_v53 = vsel %vm51_vm0, %v1211_v50, 0.0  ;;  %v70_v59 = vsel %vm51_vm0, %v1232_v56, 0.0  ;;  %v1248_v61 = vld [vmem:[%s1632_s0 + $0x78] sm:$0xff]  ;;  %v73_v62 = vsel %vm51_vm0, %v1243_v60, 0.0  ;;  %s1004_s10 = smov 8  }
   0xf   :  { %v121_v63 = vsel %vm51_vm0, %v1248_v61, 0.0 }
  0x13   :  { %56 = vadd.xlane.f32.xlu0 %v55_v15  ;;  %83 = vadd.xlane.f32.xlu2 %v82_v16 }
  0x14   :  { %104 = vadd.xlane.f32.xlu1 %v103_v17 }
  0x1b   :  { %131 = vadd.xlane.f32.xlu0 %v130_v21  ;;  %107 = vadd.xlane.f32.xlu2 %v106_v22 }
  0x1c   :  { %59 = vadd.xlane.f32.xlu1 %v58_v23 }
  0x23   :  { %86 = vadd.xlane.f32.xlu0 %v85_v27  ;;  %62 = vadd.xlane.f32.xlu2 %v61_v28 }
  0x24   :  { %134 = vadd.xlane.f32.xlu1 %v133_v29 }
  0x2b   :  { %110 = vadd.xlane.f32.xlu0 %v109_v33  ;;  %137 = vadd.xlane.f32.xlu2 %v136_v34 }
  0x2c   :  { %89 = vadd.xlane.f32.xlu1 %v88_v35 }
  0x33   :  { %65 = vadd.xlane.f32.xlu0 %v64_v39  ;;  %92 = vadd.xlane.f32.xlu2 %v91_v40 }
  0x34   :  { %113 = vadd.xlane.f32.xlu1 %v112_v41 }
  0x3b   :  { %140 = vadd.xlane.f32.xlu0 %v139_v45  ;;  %116 = vadd.xlane.f32.xlu2 %v115_v46 }
  0x3c   :  { %68 = vadd.xlane.f32.xlu1 %v67_v47 }
  0x43   :  { %95 = vadd.xlane.f32.xlu0 %v94_v51  ;;  %119 = vadd.xlane.f32.xlu2 %v118_v52 }
  0x44   :  { %143 = vadd.xlane.f32.xlu1 %v142_v53 }
  0x4b   :  { %98 = vadd.xlane.f32.xlu2 %v97_v57  ;;  %146 = vadd.xlane.f32.xlu0 %v145_v58 }
  0x4c   :  { %71 = vadd.xlane.f32.xlu1 %v70_v59 }
  0x53   :  { %74 = vadd.xlane.f32.xlu0 %v73_v62 }
  0x54   :  { %122 = vadd.xlane.f32.xlu1 %v121_v63 }
  0x76   :  { %v81_v3 = vpop.xlane.xlu2 %80  ;;  %v78_v4 = vpop.xlane.xlu0 %77 }
  0x77   :  { %v54_v5 = vpop.xlane.xlu1 %53 }
  0x7e   :  { %v129_v9 = vpop.xlane.xlu2 %128  ;;  %v126_v10 = vpop.xlane.xlu0 %125 }
  0x7f   :  { %v157_v11 = vadd.f32 %v129_v9, %v81_v3  ;;  %v156_v15 = vadd.f32 %v126_v10, %v78_v4  ;;  %v102_v16 = vpop.xlane.xlu1 %101 }
  0x80   :  { %v148_v17 = vadd.f32 %v102_v16, %v54_v5 }
  0x81   :  { %v172_v21 = vmul.f32 0.0078125, %v156_v15  ;;  %v173_v22 = vmul.f32 0.0078125, %v157_v11 }
  0x82   :  { %v164_v23 = vmul.f32 0.0078125, %v148_v17 }
  0x83   :  { %v1255_v27 = vsub.f32 %v1038_v1, %v172_v21  ;;  %v1258_v28 = vsub.f32 %v1059_v7, %v172_v21  ;;  %v1268_v35 = vsub.f32 %v1054_v6, %v173_v22  ;;  %v1278_v46 = vsub.f32 %v1033_v0, %v173_v22 }
  0x84   :  { %v1261_v29 = vsub.f32 %v1064_v8, %v164_v23  ;;  %v1273_v7 = vsub.f32 %v1043_v2, %v164_v23 }
  0x85   :  { %v220_v33 = vmul.f32 %v1255_v27, %v1255_v27  ;;  %v284_v34 = vmul.f32 %v1258_v28, %v1258_v28  ;;  %v285_v51 = vmul.f32 %v1268_v35, %v1268_v35  ;;  %v221_v53 = vmul.f32 %v1278_v46, %v1278_v46 }
  0x86   :  { %v57_v39 = vpop.xlane.xlu0 %56  ;;  %v84_v40 = vpop.xlane.xlu2 %83  ;;  %v276_v1 = vmul.f32 %v1261_v29, %v1261_v29  ;;  %v212_v2 = vmul.f32 %v1273_v7, %v1273_v7 }
  0x87   :  { %v105_v41 = vpop.xlane.xlu1 %104  ;;  %v252_v8 = vsel %vm51_vm0, %v220_v33, 0.0  ;;  %v316_v45 = vsel %vm51_vm0, %v284_v34, 0.0  ;;  %v319_v0 = vsel %vm51_vm0, %v285_v51, 0.0  ;;  %v255_v9 = vsel %vm51_vm0, %v221_v53, 0.0 }
  0x88   :  { %v149_v47 = vadd.f32 %v105_v41, %v57_v39  ;;  %253 = vadd.xlane.f32.xlu2 %v252_v8  ;;  %317 = vadd.xlane.f32.xlu0 %v316_v45  ;;  %v292_v6 = vsel %vm51_vm0, %v276_v1, 0.0  ;;  %v228_v4 = vsel %vm51_vm0, %v212_v2, 0.0 }
  0x89   :  { %293 = vadd.xlane.f32.xlu1 %v292_v6 }
  0x8a   :  { %v165_v52 = vmul.f32 0.0078125, %v149_v47 }
  0x8c   :  { %v1289_v59 = vsub.f32 %v1075_v12, %v165_v52  ;;  %v1292_v62 = vsub.f32 %v1085_v14, %v165_v52 }
  0x8e   :  { %v132_v57 = vpop.xlane.xlu0 %131  ;;  %v108_v58 = vpop.xlane.xlu2 %107  ;;  %v277_v12 = vmul.f32 %v1292_v62, %v1292_v62  ;;  %v213_v14 = vmul.f32 %v1289_v59, %v1289_v59 }
  0x8f   :  { %v158_v63 = vadd.f32 %v132_v57, %v84_v40  ;;  %v60_v3 = vpop.xlane.xlu1 %59 }
  0x90   :  { %v150_v5 = vadd.f32 %v108_v58, %v60_v3  ;;  %320 = vadd.xlane.f32.xlu2 %v319_v0  ;;  %229 = vadd.xlane.f32.xlu0 %v228_v4  ;;  %v295_v34 = vsel %vm51_vm0, %v277_v12, 0.0  ;;  %v231_v39 = vsel %vm51_vm0, %v213_v14, 0.0 }
  0x91   :  { %v174_v10 = vmul.f32 0.0078125, %v158_v63  ;;  %256 = vadd.xlane.f32.xlu1 %v255_v9 }
  0x92   :  { %v166_v15 = vmul.f32 0.0078125, %v150_v5 }
  0x93   :  { %v1297_v11 = vsub.f32 %v1080_v13, %v174_v10  ;;  %v1306_v17 = vsub.f32 %v1096_v18, %v174_v10 }
  0x94   :  { %v1309_v23 = vsub.f32 %v1106_v20, %v166_v15  ;;  %v1315_v40 = vsub.f32 %v1101_v19, %v166_v15 }
  0x95   :  { %v222_v16 = vmul.f32 %v1297_v11, %v1297_v11  ;;  %v286_v18 = vmul.f32 %v1306_v17, %v1306_v17 }
  0x96   :  { %v87_v21 = vpop.xlane.xlu0 %86  ;;  %v63_v22 = vpop.xlane.xlu2 %62  ;;  %v214_v20 = vmul.f32 %v1309_v23, %v1309_v23  ;;  %v278_v8 = vmul.f32 %v1315_v40, %v1315_v40 }
  0x97   :  { %v135_v13 = vpop.xlane.xlu1 %134  ;;  %v258_v33 = vsel %vm51_vm0, %v222_v16, 0.0  ;;  %v322_v6 = vsel %vm51_vm0, %v286_v18, 0.0 }
  0x98   :  { %v159_v1 = vadd.f32 %v135_v13, %v87_v21  ;;  %296 = vadd.xlane.f32.xlu0 %v295_v34  ;;  %232 = vadd.xlane.f32.xlu2 %v231_v39  ;;  %v234_v53 = vsel %vm51_vm0, %v214_v20, 0.0  ;;  %v298_v58 = vsel %vm51_vm0, %v278_v8, 0.0 }
  0x99   :  { %259 = vadd.xlane.f32.xlu1 %v258_v33 }
  0x9a   :  { %v175_v41 = vmul.f32 0.0078125, %v159_v1 }
  0x9c   :  { %v1325_v19 = vsub.f32 %v1117_v24, %v175_v41  ;;  %v1328_v51 = vsub.f32 %v1127_v26, %v175_v41 }
  0x9e   :  { %v111_v45 = vpop.xlane.xlu0 %110  ;;  %v138_v47 = vpop.xlane.xlu2 %137  ;;  %v287_v24 = vmul.f32 %v1328_v51, %v1328_v51  ;;  %v223_v26 = vmul.f32 %v1325_v19, %v1325_v19 }
  0x9f   :  { %v151_v52 = vadd.f32 %v111_v45, %v63_v22  ;;  %v90_v2 = vpop.xlane.xlu1 %89 }
  0xa0   :  { %v160_v57 = vadd.f32 %v138_v47, %v90_v2  ;;  %323 = vadd.xlane.f32.xlu2 %v322_v6  ;;  %235 = vadd.xlane.f32.xlu0 %v234_v53  ;;  %v325_v14 = vsel %vm51_vm0, %v287_v24, 0.0  ;;  %v261_v16 = vsel %vm51_vm0, %v223_v26, 0.0 }
  0xa1   :  { %v167_v0 = vmul.f32 0.0078125, %v151_v52  ;;  %299 = vadd.xlane.f32.xlu1 %v298_v58 }
  0xa2   :  { %v176_v3 = vmul.f32 0.0078125, %v160_v57 }
  0xa3   :  { %v1333_v63 = vsub.f32 %v1122_v25, %v167_v0  ;;  %v1342_v5 = vsub.f32 %v1138_v30, %v167_v0 }
  0xa4   :  { %v1345_v15 = vsub.f32 %v1148_v32, %v176_v3  ;;  %v1351_v21 = vsub.f32 %v1143_v31, %v176_v3 }
  0xa5   :  { %v215_v4 = vmul.f32 %v1333_v63, %v1333_v63  ;;  %v279_v30 = vmul.f32 %v1342_v5, %v1342_v5 }
  0xa6   :  { %v66_v9 = vpop.xlane.xlu0 %65  ;;  %v93_v10 = vpop.xlane.xlu2 %92  ;;  %v224_v32 = vmul.f32 %v1345_v15, %v1345_v15  ;;  %v288_v33 = vmul.f32 %v1351_v21, %v1351_v21 }
  0xa7   :  { %v114_v25 = vpop.xlane.xlu1 %113  ;;  %v237_v12 = vsel %vm51_vm0, %v215_v4, 0.0  ;;  %v301_v1 = vsel %vm51_vm0, %v279_v30, 0.0 }
  0xa8   :  { %v152_v22 = vadd.f32 %v114_v25, %v66_v9  ;;  %326 = vadd.xlane.f32.xlu0 %v325_v14  ;;  %262 = vadd.xlane.f32.xlu2 %v261_v16  ;;  %v264_v8 = vsel %vm51_vm0, %v224_v32, 0.0  ;;  %v328_v47 = vsel %vm51_vm0, %v288_v33, 0.0 }
  0xa9   :  { %238 = vadd.xlane.f32.xlu1 %v237_v12 }
  0xaa   :  { %v168_v13 = vmul.f32 0.0078125, %v152_v22 }
  0xac   :  { %v1361_v31 = vsub.f32 %v1159_v36, %v168_v13  ;;  %v1364_v18 = vsub.f32 %v1169_v38, %v168_v13 }
  0xae   :  { %v141_v34 = vpop.xlane.xlu0 %140  ;;  %v117_v39 = vpop.xlane.xlu2 %116  ;;  %v280_v36 = vmul.f32 %v1364_v18, %v1364_v18  ;;  %v216_v38 = vmul.f32 %v1361_v31, %v1361_v31 }
  0xaf   :  { %v161_v41 = vadd.f32 %v141_v34, %v93_v10  ;;  %v69_v20 = vpop.xlane.xlu1 %68 }
  0xb0   :  { %v153_v45 = vadd.f32 %v117_v39, %v69_v20  ;;  %302 = vadd.xlane.f32.xlu2 %v301_v1  ;;  %265 = vadd.xlane.f32.xlu0 %v264_v8  ;;  %v304_v26 = vsel %vm51_vm0, %v280_v36, 0.0  ;;  %v240_v4 = vsel %vm51_vm0, %v216_v38, 0.0 }
  0xb1   :  { %v177_v6 = vmul.f32 0.0078125, %v161_v41  ;;  %329 = vadd.xlane.f32.xlu1 %v328_v47 }
  0xb2   :  { %v169_v2 = vmul.f32 0.0078125, %v153_v45 }
  0xb3   :  { %v1369_v52 = vsub.f32 %v1164_v37, %v177_v6  ;;  %v1378_v57 = vsub.f32 %v1180_v42, %v177_v6 }
  0xb4   :  { %v1381_v3 = vsub.f32 %v1190_v44, %v169_v2  ;;  %v1387_v9 = vsub.f32 %v1185_v43, %v169_v2 }
  0xb5   :  { %v225_v53 = vmul.f32 %v1369_v52, %v1369_v52  ;;  %v289_v42 = vmul.f32 %v1378_v57, %v1378_v57 }
  0xb6   :  { %v96_v58 = vpop.xlane.xlu0 %95  ;;  %v120_v0 = vpop.xlane.xlu2 %119  ;;  %v217_v44 = vmul.f32 %v1381_v3, %v1381_v3  ;;  %v281_v12 = vmul.f32 %v1387_v9, %v1387_v9 }
  0xb7   :  { %v144_v37 = vpop.xlane.xlu1 %143  ;;  %v267_v24 = vsel %vm51_vm0, %v225_v53, 0.0  ;;  %v331_v14 = vsel %vm51_vm0, %v289_v42, 0.0 }
  0xb8   :  { %v162_v10 = vadd.f32 %v144_v37, %v96_v58  ;;  %305 = vadd.xlane.f32.xlu0 %v304_v26  ;;  %241 = vadd.xlane.f32.xlu2 %v240_v4  ;;  %v243_v32 = vsel %vm51_vm0, %v217_v44, 0.0  ;;  %v307_v39 = vsel %vm51_vm0, %v281_v12, 0.0  ;;  %v595_v44 = vld [vmem:[%s1634_s2 + $0x38] sm:$0xff] }
  0xb9   :  { %268 = vadd.xlane.f32.xlu1 %v267_v24  ;;  %v587_v12 = vld [vmem:[%s1633_s1 + $0x38] sm:$0xff]  ;;  %924 = vmatpush.msra.mxu2 %v595_v44 }
  0xba   :  { %v178_v25 = vmul.f32 0.0078125, %v162_v10  ;;  %932 = vmatpush.msra.mxu3 %v587_v12  ;;  %652 = vmatpush.msra.mxu0 %v595_v44 }
  0xbb   :  { %765 = vmatpush.msra.mxu1 %v587_v12 }
  0xbc   :  { %v1397_v43 = vsub.f32 %v1201_v48, %v178_v25  ;;  %v1400_v30 = vsub.f32 %v1211_v50, %v178_v25 }
  0xbe   :  { %v99_v16 = vpop.xlane.xlu2 %98  ;;  %v147_v22 = vpop.xlane.xlu0 %146  ;;  %v290_v20 = vmul.f32 %v1400_v30, %v1400_v30  ;;  %v226_v48 = vmul.f32 %v1397_v43, %v1397_v43 }
  0xbf   :  { %v72_v13 = vpop.xlane.xlu1 %71  ;;  %v163_v33 = vadd.f32 %v147_v22, %v99_v16  ;;  %v586_v16 = vld [vmem:[%s1633_s1 + $0x30] sm:$0xff]  ;;  %v593_v22 = vld [vmem:[%s1634_s2 + $0x28] sm:$0xff] }
  0xc0   :  { %v154_v34 = vadd.f32 %v120_v0, %v72_v13  ;;  %332 = vadd.xlane.f32.xlu2 %v331_v14  ;;  %244 = vadd.xlane.f32.xlu0 %v243_v32  ;;  %v334_v36 = vsel %vm51_vm0, %v290_v20, 0.0  ;;  %v270_v38 = vsel %vm51_vm0, %v226_v48, 0.0  ;;  %v594_v14 = vld [vmem:[%s1634_s2 + $0x30] sm:$0xff]  ;;  %v585_v13 = vld [vmem:[%s1633_s1 + $0x28] sm:$0xff]  ;;  %v592_v32 = vld [vmem:[%s1634_s2 + $0x20] sm:$0xff] }
  0xc1   :  { %308 = vadd.xlane.f32.xlu1 %v307_v39  ;;  %v179_v1 = vmul.f32 0.0078125, %v163_v33  ;;  %925 = vmatpush.msra.mxu2 %v594_v14  ;;  %v584_v33 = vld [vmem:[%s1633_s1 + $0x20] sm:$0xff]  ;;  %v583_v39 = vld [vmem:[%s1633_s1 + $0x18] sm:$0xff]  ;;  %v589_v20 = vld [vmem:[%s1634_s2 + $0x8] sm:$0xff] }
  0xc2   :  { %v170_v41 = vmul.f32 0.0078125, %v154_v34  ;;  %933 = vmatpush.msra.mxu3 %v586_v16  ;;  %653 = vmatpush.msra.mxu0 %v594_v14  ;;  %v591_v34 = vld [vmem:[%s1634_s2 + $0x18] sm:$0xff]  ;;  %v581_v48 = vld [vmem:[%s1633_s1 + $0x8] sm:$0xff] }
  0xc3   :  { %v1412_v8 = vsub.f32 %v1222_v54, %v179_v1  ;;  %v1415_v45 = vsub.f32 %v1227_v55, %v179_v1  ;;  %766 = vmatpush.msra.mxu1 %v586_v16  ;;  %926 = vmatpush.msra.mxu2 %v593_v22  ;;  %v590_v1 = vld [vmem:[%s1634_s2 + $0x10] sm:$0xff] }
  0xc4   :  { %v1409_v50 = vsub.f32 %v1232_v56, %v170_v41  ;;  %v1420_v2 = vsub.f32 %v1206_v49, %v170_v41  ;;  %934 = vmatpush.msra.mxu3 %v585_v13  ;;  %654 = vmatpush.msra.mxu0 %v593_v22  ;;  %v582_v41 = vld [vmem:[%s1633_s1 + $0x10] sm:$0xff] }
  0xc5   :  { %v227_v55 = vmul.f32 %v1412_v8, %v1412_v8  ;;  %v291_v0 = vmul.f32 %v1415_v45, %v1415_v45  ;;  %767 = vmatpush.msra.mxu1 %v585_v13  ;;  %927 = vmatpush.msra.mxu2 %v592_v32 }
  0xc6   :  { %v218_v47 = vmul.f32 %v1409_v50, %v1409_v50  ;;  %v75_v6 = vpop.xlane.xlu0 %74  ;;  %v282_v49 = vmul.f32 %v1420_v2, %v1420_v2  ;;  %935 = vmatpush.msra.mxu3 %v584_v33  ;;  %655 = vmatpush.msra.mxu0 %v592_v32 }
  0xc7   :  { %v123_v53 = vpop.xlane.xlu1 %122  ;;  %v273_v26 = vsel %vm51_vm0, %v227_v55, 0.0  ;;  %v337_v4 = vsel %vm51_vm0, %v291_v0, 0.0  ;;  %768 = vmatpush.msra.mxu1 %v584_v33  ;;  %928 = vmatpush.msra.mxu2 %v591_v34 }
  0xc8   :  { %335 = vadd.xlane.f32.xlu0 %v334_v36  ;;  %271 = vadd.xlane.f32.xlu2 %v270_v38  ;;  %v246_v54 = vsel %vm51_vm0, %v218_v47, 0.0  ;;  %v155_v56 = vadd.f32 %v123_v53, %v75_v6  ;;  %v310_v10 = vsel %vm51_vm0, %v282_v49, 0.0  ;;  %v588_v47 = vld [vmem:[%s1634_s2] sm:$0xff] }
  0xc9   :  { %247 = vadd.xlane.f32.xlu1 %v246_v54  ;;  %936 = vmatpush.msra.mxu3 %v583_v39  ;;  %v580_v6 = vld [vmem:[%s1633_s1] sm:$0xff] }
  0xca   :  { %v171_v58 = vmul.f32 0.0078125, %v155_v56  ;;  %656 = vmatpush.msra.mxu0 %v591_v34  ;;  %769 = vmatpush.msra.mxu1 %v583_v39 }
  0xcb   :  { %929 = vmatpush.msra.mxu2 %v590_v1  ;;  %937 = vmatpush.msra.mxu3 %v582_v41 }
  0xcc   :  { %v1432_v37 = vsub.f32 %v1243_v60, %v171_v58  ;;  %v1435_v24 = vsub.f32 %v1248_v61, %v171_v58  ;;  %657 = vmatpush.msra.mxu0 %v590_v1  ;;  %770 = vmatpush.msra.mxu1 %v582_v41 }
  0xcd   :  { %930 = vmatpush.msra.mxu2 %v589_v20  ;;  %938 = vmatpush.msra.mxu3 %v581_v48 }
  0xce   :  { %v283_v42 = vmul.f32 %v1435_v24, %v1435_v24  ;;  %v219_v25 = vmul.f32 %v1432_v37, %v1432_v37  ;;  %658 = vmatpush.msra.mxu0 %v589_v20  ;;  %771 = vmatpush.msra.mxu1 %v581_v48 }
  0xcf   :  { %931 = vmatpush.msra.mxu2 %v588_v47  ;;  %939 = vmatpush.msra.mxu3 %v580_v6 }
  0xd0   :  { %274 = vadd.xlane.f32.xlu0 %v273_v26  ;;  %311 = vadd.xlane.f32.xlu2 %v310_v10  ;;  %v313_v60 = vsel %vm51_vm0, %v283_v42, 0.0  ;;  %v249_v61 = vsel %vm51_vm0, %v219_v25, 0.0 }
  0xd1   :  { %338 = vadd.xlane.f32.xlu1 %v337_v4  ;;  %659 = vmatpush.msra.mxu0 %v588_v47 }
  0xd2   :  { %772 = vmatpush.msra.mxu1 %v580_v6 }
  0xd8   :  { %314 = vadd.xlane.f32.xlu0 %v313_v60  ;;  %250 = vadd.xlane.f32.xlu2 %v249_v61 }
  0xfb   :  { %v254_v36 = vpop.xlane.xlu2 %253  ;;  %v318_v38 = vpop.xlane.xlu0 %317 }
  0xfc   :  { %v348_v53 = vadd.f32 %v318_v38, %v254_v36  ;;  %v294_v54 = vpop.xlane.xlu1 %293 }
  0xfe   :  { %v364_v56 = vmul.f32 0.0078125, %v348_v53 }
 0x100   :  { %v380_v55 = vadd.f32 1e-05, %v364_v56 }
 0x102   :  { %944 = vrsqrt.f32 %v380_v55  ;;  %vm474_vm2 = vweird.f32 %v380_v55 }
 0x103   :  { %v321_v58 = vpop.xlane.xlu2 %320  ;;  %v230_v0 = vpop.xlane.xlu0 %229 }
 0x104   :  { %v340_v49 = vadd.f32 %v294_v54, %v230_v0  ;;  %v257_v26 = vpop.xlane.xlu1 %256 }
 0x105   :  { %v349_v4 = vadd.f32 %v321_v58, %v257_v26 }
 0x106   :  { %v356_v10 = vmul.f32 0.0078125, %v340_v49 }
 0x107   :  { %v365_v42 = vmul.f32 0.0078125, %v349_v4 }
 0x108   :  { %v945_v25 = vpop.eup %944  ;;  %v372_v60 = vadd.f32 1e-05, %v356_v10 }
 0x109   :  { %v469_v61 = vmul.f32 %v945_v25, %v380_v55  ;;  %v381_v44 = vadd.f32 1e-05, %v365_v42  ;;  %vm475_vm1 = vweird.f32 %v945_v25 }
 0x10a   :  { %946 = vrsqrt.f32 %v372_v60  ;;  %vm476_vm3 = vmor %vm474_vm2, %vm475_vm1  ;;  %vm394_vm6 = vweird.f32 %v372_v60 }
 0x10b   :  { %v470_v12 = vmul.f32 %v945_v25, %v469_v61  ;;  %948 = vrsqrt.f32 %v381_v44  ;;  %v297_v14 = vpop.xlane.xlu0 %296  ;;  %v233_v16 = vpop.xlane.xlu2 %232  ;;  %vm484_vm8 = vweird.f32 %v381_v44 }
 0x10c   :  { %v341_v22 = vadd.f32 %v297_v14, %v233_v16  ;;  %v260_v13 = vpop.xlane.xlu1 %259 }
 0x10d   :  { %v471_v32 = vmul.f32 0.5, %v470_v12 }
 0x10e   :  { %v357_v33 = vmul.f32 0.0078125, %v341_v22 }
 0x10f   :  { %v472_v34 = vsub.f32 1.5, %v471_v32 }
 0x110   :  { %v947_v39 = vpop.eup %946  ;;  %v1494_v1 = vadd.f32 1e-05, %v357_v33 }
 0x111   :  { %v949_v41 = vpop.eup %948  ;;  %v389_v20 = vmul.f32 %v947_v39, %v372_v60  ;;  %v473_v48 = vmul.f32 %v945_v25, %v472_v34  ;;  %vm395_vm4 = vweird.f32 %v947_v39 }
 0x112   :  { %v479_v47 = vmul.f32 %v949_v41, %v381_v44  ;;  %950 = vrsqrt.f32 %v1494_v1  ;;  %vm485_vm5 = vweird.f32 %v949_v41  ;;  %vm396_vm7 = vmor %vm394_vm6, %vm395_vm4  ;;  %vm404_vm11 = vweird.f32 %v1494_v1 }
 0x113   :  { %v390_v6 = vmul.f32 %v947_v39, %v389_v20  ;;  %v324_v36 = vpop.xlane.xlu2 %323  ;;  %v236_v38 = vpop.xlane.xlu0 %235  ;;  %v477_v53 = vsel %vm476_vm3, %v945_v25, %v473_v48  ;;  %vm486_vm9 = vmor %vm484_vm8, %vm485_vm5 }
 0x114   :  { %v480_v54 = vmul.f32 %v949_v41, %v479_v47  ;;  %v350_v56 = vadd.f32 %v324_v36, %v260_v13  ;;  %v300_v58 = vpop.xlane.xlu1 %299  ;;  %v572_v0 = vmul.f32 %v477_v53, %v1258_v28  ;;  %v556_v49 = vmul.f32 %v477_v53, %v1255_v27 }
 0x115   :  { %v391_v26 = vmul.f32 0.5, %v390_v6  ;;  %v342_v4 = vadd.f32 %v300_v58, %v236_v38 }
 0x116   :  { %v481_v55 = vmul.f32 0.5, %v480_v54  ;;  %v366_v10 = vmul.f32 0.0078125, %v350_v56  ;;  %900 = vmatmul.msk.f32.vlgmr.msra.gmra.mxu2 %vm51_vm0, %v572_v0  ;;  %916 = vmatmul.msk.f32.vlgmr.msra.gmra.mxu3 %vm51_vm0, %v556_v49 }
 0x117   :  { %v392_v42 = vsub.f32 1.5, %v391_v26  ;;  %v358_v61 = vmul.f32 0.0078125, %v342_v4 }
 0x118   :  { %v951_v12 = vpop.eup %950  ;;  %v482_v25 = vsub.f32 1.5, %v481_v55  ;;  %v1501_v14 = vadd.f32 1e-05, %v366_v10 }
 0x119   :  { %v399_v28 = vmul.f32 %v951_v12, %v1494_v1  ;;  %v1504_v27 = vadd.f32 1e-05, %v358_v61  ;;  %v393_v16 = vmul.f32 %v947_v39, %v392_v42  ;;  %vm405_vm10 = vweird.f32 %v951_v12 }
 0x11a   :  { %952 = vrsqrt.f32 %v1501_v14  ;;  %v483_v22 = vmul.f32 %v949_v41, %v482_v25  ;;  %vm406_vm12 = vmor %vm404_vm11, %vm405_vm10  ;;  %vm494_vm15 = vweird.f32 %v1501_v14 }
 0x11b   :  { %v400_v13 = vmul.f32 %v951_v12, %v399_v28  ;;  %954 = vrsqrt.f32 %v1504_v27  ;;  %v327_v32 = vpop.xlane.xlu0 %326  ;;  %v263_v33 = vpop.xlane.xlu2 %262  ;;  %v397_v34 = vsel %vm396_vm7, %v947_v39, %v393_v16  ;;  %vm414_vm2 = vweird.f32 %v1504_v27 }
 0x11c   :  { %v351_v20 = vadd.f32 %v327_v32, %v263_v33  ;;  %v239_v48 = vpop.xlane.xlu1 %238  ;;  %v564_v60 = vmul.f32 %v397_v34, %v1261_v29  ;;  %v487_v47 = vsel %vm486_vm9, %v949_v41, %v483_v22  ;;  %v548_v6 = vmul.f32 %v397_v34, %v1273_v7 }
 0x11d   :  { %v401_v36 = vmul.f32 0.5, %v400_v13  ;;  %v573_v44 = vmul.f32 %v487_v47, %v1268_v35  ;;  %v557_v38 = vmul.f32 %v487_v47, %v1278_v46 }
 0x11e   :  { %v367_v53 = vmul.f32 0.0078125, %v351_v20  ;;  %892 = vmatmul.msk.f32.vlgmr.msra.gmra.mxu0 %vm51_vm0, %v564_v60  ;;  %908 = vmatmul.msk.f32.vlgmr.msra.gmra.mxu1 %vm51_vm0, %v548_v6 }
 0x11f   :  { %v402_v54 = vsub.f32 1.5, %v401_v36  ;;  %901 = vmatmul.msk.f32.gmra.mxu2 %vm51_vm0, %v573_v44  ;;  %917 = vmatmul.msk.f32.gmra.mxu3 %vm51_vm0, %v557_v38 }
 0x120   :  { %v953_v29 = vpop.eup %952  ;;  %v1516_v39 = vadd.f32 1e-05, %v367_v53 }
 0x121   :  { %v955_v7 = vpop.eup %954  ;;  %v489_v35 = vmul.f32 %v953_v29, %v1501_v14  ;;  %v403_v46 = vmul.f32 %v951_v12, %v402_v54  ;;  %vm495_vm13 = vweird.f32 %v953_v29 }
 0x122   :  { %v409_v41 = vmul.f32 %v955_v7, %v1504_v27  ;;  %956 = vrsqrt.f32 %v1516_v39  ;;  %vm415_vm14 = vweird.f32 %v955_v7  ;;  %vm496_vm1 = vmor %vm494_vm15, %vm495_vm13  ;;  %vm504_vm5 = vweird.f32 %v1516_v39 }
 0x123   :  { %v490_v56 = vmul.f32 %v953_v29, %v489_v35  ;;  %v303_v58 = vpop.xlane.xlu2 %302  ;;  %v266_v0 = vpop.xlane.xlu0 %265  ;;  %v407_v49 = vsel %vm406_vm12, %v951_v12, %v403_v46  ;;  %vm416_vm3 = vmor %vm414_vm2, %vm415_vm14 }
 0x124   :  { %v410_v26 = vmul.f32 %v955_v7, %v409_v41  ;;  %v343_v4 = vadd.f32 %v303_v58, %v239_v48  ;;  %v330_v55 = vpop.xlane.xlu1 %329  ;;  %v565_v10 = vmul.f32 %v407_v49, %v1292_v62  ;;  %v549_v42 = vmul.f32 %v407_v49, %v1289_v59 }
 0x125   :  { %v491_v1 = vmul.f32 0.5, %v490_v56  ;;  %v352_v61 = vadd.f32 %v330_v55, %v266_v0 }
 0x126   :  { %v411_v25 = vmul.f32 0.5, %v410_v26  ;;  %v359_v28 = vmul.f32 0.0078125, %v343_v4  ;;  %893 = vmatmul.msk.f32.gmra.mxu0 %vm51_vm0, %v565_v10  ;;  %909 = vmatmul.msk.f32.gmra.mxu1 %vm51_vm0, %v549_v42 }
 0x127   :  { %v492_v16 = vsub.f32 1.5, %v491_v1  ;;  %v368_v22 = vmul.f32 0.0078125, %v352_v61 }
 0x128   :  { %v957_v13 = vpop.eup %956  ;;  %v412_v12 = vsub.f32 1.5, %v411_v25  ;;  %v1526_v32 = vadd.f32 1e-05, %v359_v28 }
 0x129   :  { %v499_v59 = vmul.f32 %v957_v13, %v1516_v39  ;;  %v1530_v62 = vadd.f32 1e-05, %v368_v22  ;;  %v493_v33 = vmul.f32 %v953_v29, %v492_v16  ;;  %vm505_vm4 = vweird.f32 %v957_v13 }
 0x12a   :  { %958 = vrsqrt.f32 %v1526_v32  ;;  %v413_v34 = vmul.f32 %v955_v7, %v412_v12  ;;  %vm506_vm6 = vmor %vm504_vm5, %vm505_vm4  ;;  %vm424_vm9 = vweird.f32 %v1526_v32 }
 0x12b   :  { %v500_v20 = vmul.f32 %v957_v13, %v499_v59  ;;  %960 = vrsqrt.f32 %v1530_v62  ;;  %v306_v48 = vpop.xlane.xlu0 %305  ;;  %v242_v60 = vpop.xlane.xlu2 %241  ;;  %v497_v47 = vsel %vm496_vm1, %v953_v29, %v493_v33  ;;  %vm514_vm11 = vweird.f32 %v1530_v62 }
 0x12c   :  { %v344_v6 = vadd.f32 %v306_v48, %v242_v60  ;;  %v269_v14 = vpop.xlane.xlu1 %268  ;;  %v417_v36 = vsel %vm416_vm3, %v955_v7, %v413_v34  ;;  %v574_v44 = vmul.f32 %v497_v47, %v1306_v17  ;;  %v558_v38 = vmul.f32 %v497_v47, %v1297_v11 }
 0x12d   :  { %v501_v53 = vmul.f32 0.5, %v500_v20  ;;  %v566_v27 = vmul.f32 %v417_v36, %v1315_v40  ;;  %v550_v54 = vmul.f32 %v417_v36, %v1309_v23 }
 0x12e   :  { %v360_v35 = vmul.f32 0.0078125, %v344_v6  ;;  %902 = vmatmul.msk.f32.gmra.mxu2 %vm51_vm0, %v574_v44  ;;  %918 = vmatmul.msk.f32.gmra.mxu3 %vm51_vm0, %v558_v38 }
 0x12f   :  { %v502_v46 = vsub.f32 1.5, %v501_v53  ;;  %894 = vmatmul.msk.f32.gmra.mxu0 %vm51_vm0, %v566_v27  ;;  %910 = vmatmul.msk.f32.gmra.mxu1 %vm51_vm0, %v550_v54 }
 0x130   :  { %v959_v29 = vpop.eup %958  ;;  %v1543_v17 = vadd.f32 1e-05, %v360_v35 }
 0x131   :  { %v961_v11 = vpop.eup %960  ;;  %v419_v40 = vmul.f32 %v959_v29, %v1526_v32  ;;  %v503_v23 = vmul.f32 %v957_v13, %v502_v46  ;;  %vm425_vm7 = vweird.f32 %v959_v29 }
 0x132   :  { %v509_v7 = vmul.f32 %v961_v11, %v1530_v62  ;;  %962 = vrsqrt.f32 %v1543_v17  ;;  %vm515_vm8 = vweird.f32 %v961_v11  ;;  %vm426_vm10 = vmor %vm424_vm9, %vm425_vm7  ;;  %vm434_vm14 = vweird.f32 %v1543_v17 }
 0x133   :  { %v420_v41 = vmul.f32 %v959_v29, %v419_v40  ;;  %v333_v56 = vpop.xlane.xlu2 %332  ;;  %v245_v58 = vpop.xlane.xlu0 %244  ;;  %v507_v0 = vsel %vm506_vm6, %v957_v13, %v503_v23  ;;  %vm516_vm12 = vmor %vm514_vm11, %vm515_vm8 }
 0x134   :  { %v510_v49 = vmul.f32 %v961_v11, %v509_v7  ;;  %v353_v26 = vadd.f32 %v333_v56, %v269_v14  ;;  %v309_v4 = vpop.xlane.xlu1 %308  ;;  %v575_v55 = vmul.f32 %v507_v0, %v1328_v51  ;;  %v559_v10 = vmul.f32 %v507_v0, %v1325_v19 }
 0x135   :  { %v421_v39 = vmul.f32 0.5, %v420_v41  ;;  %v345_v42 = vadd.f32 %v309_v4, %v245_v58 }
 0x136   :  { %v511_v1 = vmul.f32 0.5, %v510_v49  ;;  %v369_v61 = vmul.f32 0.0078125, %v353_v26  ;;  %903 = vmatmul.msk.f32.gmra.mxu2 %vm51_vm0, %v575_v55  ;;  %919 = vmatmul.msk.f32.gmra.mxu3 %vm51_vm0, %v559_v10 }
 0x137   :  { %v422_v25 = vsub.f32 1.5, %v421_v39  ;;  %v361_v28 = vmul.f32 0.0078125, %v345_v42 }
 0x138   :  { %v963_v16 = vpop.eup %962  ;;  %v512_v22 = vsub.f32 1.5, %v511_v1  ;;  %v1553_v13 = vadd.f32 1e-05, %v369_v61 }
 0x139   :  { %v429_v19 = vmul.f32 %v963_v16, %v1543_v17  ;;  %v1557_v51 = vadd.f32 1e-05, %v361_v28  ;;  %v423_v12 = vmul.f32 %v959_v29, %v422_v25  ;;  %vm435_vm13 = vweird.f32 %v963_v16 }
 0x13a   :  { %964 = vrsqrt.f32 %v1553_v13  ;;  %v513_v59 = vmul.f32 %v961_v11, %v512_v22  ;;  %vm436_vm15 = vmor %vm434_vm14, %vm435_vm13  ;;  %vm524_vm3 = vweird.f32 %v1553_v13 }
 0x13b   :  { %v430_v33 = vmul.f32 %v963_v16, %v429_v19  ;;  %966 = vrsqrt.f32 %v1557_v51  ;;  %v336_v34 = vpop.xlane.xlu0 %335  ;;  %v272_v20 = vpop.xlane.xlu2 %271  ;;  %v427_v48 = vsel %vm426_vm10, %v959_v29, %v423_v12  ;;  %vm444_vm5 = vweird.f32 %v1557_v51 }
 0x13c   :  { %v354_v60 = vadd.f32 %v336_v34, %v272_v20  ;;  %v248_v32 = vpop.xlane.xlu1 %247  ;;  %v567_v47 = vmul.f32 %v427_v48, %v1342_v5  ;;  %v517_v6 = vsel %vm516_vm12, %v961_v11, %v513_v59  ;;  %v551_v14 = vmul.f32 %v427_v48, %v1333_v63 }
 0x13d   :  { %v431_v36 = vmul.f32 0.5, %v430_v33  ;;  %v576_v62 = vmul.f32 %v517_v6, %v1351_v21  ;;  %v560_v44 = vmul.f32 %v517_v6, %v1345_v15 }
 0x13e   :  { %v370_v38 = vmul.f32 0.0078125, %v354_v60  ;;  %895 = vmatmul.msk.f32.gmra.mxu0 %vm51_vm0, %v567_v47  ;;  %911 = vmatmul.msk.f32.gmra.mxu1 %vm51_vm0, %v551_v14 }
 0x13f   :  { %v432_v53 = vsub.f32 1.5, %v431_v36  ;;  %904 = vmatmul.msk.f32.gmra.mxu2 %vm51_vm0, %v576_v62  ;;  %920 = vmatmul.msk.f32.gmra.mxu3 %vm51_vm0, %v560_v44 }
 0x140   :  { %v965_v5 = vpop.eup %964  ;;  %v1570_v27 = vadd.f32 1e-05, %v370_v38 }
 0x141   :  { %v967_v63 = vpop.eup %966  ;;  %v519_v21 = vmul.f32 %v965_v5, %v1553_v13  ;;  %v433_v15 = vmul.f32 %v963_v16, %v432_v53  ;;  %vm525_vm1 = vweird.f32 %v965_v5 }
 0x142   :  { %v439_v54 = vmul.f32 %v967_v63, %v1557_v51  ;;  %968 = vrsqrt.f32 %v1570_v27  ;;  %vm445_vm2 = vweird.f32 %v967_v63  ;;  %vm526_vm4 = vmor %vm524_vm3, %vm525_vm1  ;;  %vm534_vm8 = vweird.f32 %v1570_v27 }
 0x143   :  { %v520_v35 = vmul.f32 %v965_v5, %v519_v21  ;;  %v275_v46 = vpop.xlane.xlu0 %274  ;;  %v312_v29 = vpop.xlane.xlu2 %311  ;;  %v437_v11 = vsel %vm436_vm15, %v963_v16, %v433_v15  ;;  %vm446_vm6 = vmor %vm444_vm5, %vm445_vm2 }
 0x144   :  { %v440_v40 = vmul.f32 %v967_v63, %v439_v54  ;;  %v346_v23 = vadd.f32 %v312_v29, %v248_v32  ;;  %v339_v7 = vpop.xlane.xlu1 %338  ;;  %v568_v41 = vmul.f32 %v437_v11, %v1364_v18  ;;  %v552_v56 = vmul.f32 %v437_v11, %v1361_v31 }
 0x145   :  { %v521_v17 = vmul.f32 0.5, %v520_v35  ;;  %v355_v58 = vadd.f32 %v339_v7, %v275_v46 }
 0x146   :  { %v441_v0 = vmul.f32 0.5, %v440_v40  ;;  %v362_v49 = vmul.f32 0.0078125, %v346_v23  ;;  %896 = vmatmul.msk.f32.gmra.mxu0 %vm51_vm0, %v568_v41  ;;  %912 = vmatmul.msk.f32.gmra.mxu1 %vm51_vm0, %v552_v56 }
 0x147   :  { %v522_v26 = vsub.f32 1.5, %v521_v17  ;;  %v371_v4 = vmul.f32 0.0078125, %v355_v58 }
 0x148   :  { %v969_v55 = vpop.eup %968  ;;  %v442_v10 = vsub.f32 1.5, %v441_v0  ;;  %v378_v39 = vadd.f32 1e-05, %v362_v49 }
 0x149   :  { %v529_v18 = vmul.f32 %v969_v55, %v1570_v27  ;;  %v387_v31 = vadd.f32 1e-05, %v371_v4  ;;  %v523_v42 = vmul.f32 %v965_v5, %v522_v26  ;;  %vm535_vm7 = vweird.f32 %v969_v55 }
 0x14a   :  { %970 = vrsqrt.f32 %v378_v39  ;;  %v443_v1 = vmul.f32 %v967_v63, %v442_v10  ;;  %vm536_vm9 = vmor %vm534_vm8, %vm535_vm7  ;;  %vm454_vm12 = vweird.f32 %v378_v39 }
 0x14b   :  { %v530_v61 = vmul.f32 %v969_v55, %v529_v18  ;;  %972 = vrsqrt.f32 %v387_v31  ;;  %v315_v25 = vpop.xlane.xlu0 %314  ;;  %v251_v28 = vpop.xlane.xlu2 %250  ;;  %v527_v16 = vsel %vm526_vm4, %v965_v5, %v523_v42  ;;  %vm544_vm14 = vweird.f32 %v387_v31 }
 0x14c   :  { %v347_v22 = vadd.f32 %v315_v25, %v251_v28  ;;  %v447_v19 = vsel %vm446_vm6, %v967_v63, %v443_v1  ;;  %v577_v12 = vmul.f32 %v527_v16, %v1378_v57  ;;  %v561_v13 = vmul.f32 %v527_v16, %v1369_v52 }
 0x14d   :  { %v531_v59 = vmul.f32 0.5, %v530_v61  ;;  %v569_v33 = vmul.f32 %v447_v19, %v1387_v9  ;;  %v553_v34 = vmul.f32 %v447_v19, %v1381_v3 }
 0x14e   :  { %v363_v51 = vmul.f32 0.0078125, %v347_v22  ;;  %905 = vmatmul.msk.f32.gmra.mxu2 %vm51_vm0, %v577_v12  ;;  %921 = vmatmul.msk.f32.gmra.mxu3 %vm51_vm0, %v561_v13 }
 0x14f   :  { %v532_v20 = vsub.f32 1.5, %v531_v59  ;;  %897 = vmatmul.msk.f32.gmra.mxu0 %vm51_vm0, %v569_v33  ;;  %913 = vmatmul.msk.f32.gmra.mxu1 %vm51_vm0, %v553_v34 }
 0x150   :  { %v971_v48 = vpop.eup %970  ;;  %v379_v57 = vadd.f32 1e-05, %v363_v51 }
 0x151   :  { %v973_v60 = vpop.eup %972  ;;  %v449_v52 = vmul.f32 %v971_v48, %v378_v39  ;;  %v533_v9 = vmul.f32 %v969_v55, %v532_v20  ;;  %vm455_vm10 = vweird.f32 %v971_v48 }
 0x152   :  { %v539_v3 = vmul.f32 %v973_v60, %v387_v31  ;;  %974 = vrsqrt.f32 %v379_v57  ;;  %vm545_vm11 = vweird.f32 %v973_v60  ;;  %vm456_vm13 = vmor %vm454_vm12, %vm455_vm10  ;;  %vm464_vm2 = vweird.f32 %v379_v57 }
 0x153   :  { %v450_v32 = vmul.f32 %v971_v48, %v449_v52  ;;  %v537_v47 = vsel %vm536_vm9, %v969_v55, %v533_v9  ;;  %vm546_vm15 = vmor %vm544_vm14, %vm545_vm11 }
 0x154   :  { %v540_v6 = vmul.f32 %v973_v60, %v539_v3  ;;  %v578_v14 = vmul.f32 %v537_v47, %v1400_v30  ;;  %v562_v36 = vmul.f32 %v537_v47, %v1397_v43 }
 0x155   :  { %v451_v62 = vmul.f32 0.5, %v450_v32 }
 0x156   :  { %v541_v44 = vmul.f32 0.5, %v540_v6  ;;  %906 = vmatmul.msk.f32.gmra.mxu2 %vm51_vm0, %v578_v14  ;;  %922 = vmatmul.msk.f32.gmra.mxu3 %vm51_vm0, %v562_v36 }
 0x157   :  { %v452_v38 = vsub.f32 1.5, %v451_v62 }
 0x158   :  { %v975_v53 = vpop.eup %974  ;;  %v542_v5 = vsub.f32 1.5, %v541_v44 }
 0x159   :  { %v459_v27 = vmul.f32 %v975_v53, %v379_v57  ;;  %v453_v63 = vmul.f32 %v971_v48, %v452_v38  ;;  %vm465_vm1 = vweird.f32 %v975_v53 }
 0x15a   :  { %v543_v21 = vmul.f32 %v973_v60, %v542_v5  ;;  %vm466_vm3 = vmor %vm464_vm2, %vm465_vm1 }
 0x15b   :  { %v460_v30 = vmul.f32 %v975_v53, %v459_v27  ;;  %v457_v43 = vsel %vm456_vm13, %v971_v48, %v453_v63 }
 0x15c   :  { %v570_v15 = vmul.f32 %v457_v43, %v1420_v2  ;;  %v547_v54 = vsel %vm546_vm15, %v973_v60, %v543_v21  ;;  %v554_v35 = vmul.f32 %v457_v43, %v1409_v50 }
 0x15d   :  { %v461_v46 = vmul.f32 0.5, %v460_v30  ;;  %v579_v29 = vmul.f32 %v547_v54, %v1415_v45  ;;  %v563_v11 = vmul.f32 %v547_v54, %v1412_v8  ;;  %v1611_v8 = vld [vmem:[%s1635_s3] ss:$0 sm:$0xff]  ;;  %s1002_s3 = smov [#allocation2]  }
 0x15e   :  { %898 = vmatmul.msk.f32.gmra.mxu0 %vm51_vm0, %v570_v15  ;;  %914 = vmatmul.msk.f32.gmra.mxu1 %vm51_vm0, %v554_v35  ;;  %s862_s5 = sshll.u32 %s1002_s3, 4  ;;  %s863_s5 = int_to_ptr.vmem [resolvable:$true] %s862_s5 }
 0x15f   :  { %v462_v40 = vsub.f32 1.5, %v461_v46  ;;  %907 = vmatmul.msk.f32.gmra.mxu2 %vm51_vm0, %v579_v29  ;;  %923 = vmatmul.msk.f32.gmra.mxu3 %vm51_vm0, %v563_v11 }
 0x161   :  { %v463_v2 = vmul.f32 %v975_v53, %v462_v40 }
 0x163   :  { %v467_v23 = vsel %vm466_vm3, %v975_v53, %v463_v2 }
 0x164   :  { %v571_v50 = vmul.f32 %v467_v23, %v1435_v24  ;;  %v555_v45 = vmul.f32 %v467_v23, %v1432_v37 }
 0x166   :  { %899 = vmatmul.msk.f32.gmra.mxu0 %vm51_vm0, %v571_v50  ;;  %915 = vmatmul.msk.f32.gmra.mxu1 %vm51_vm0, %v555_v45 }
 0x199   :  { %v685_v7 = vpop.f32.mrf.mxu2  ;;  %v798_v41 = vpop.f32.mrf.mxu3 }
 0x19a   :  { %v799_v56 = vadd.f32 %v798_v41, %v685_v7 }
 0x19b   :  { %v661_v17 = vpop.f32.mrf.mxu0  ;;  %v774_v58 = vpop.f32.mrf.mxu1 }
 0x19c   :  { %v834_v0 = vadd.f32 %v1611_v8, %v799_v56  ;;  %v775_v49 = vadd.f32 %v774_v58, %v661_v17 }
 0x19e   :  { %850 = vst [vmem:[#allocation2 + $0x40] sm:$0xff] %v834_v0  ;;  %v826_v37 = vadd.f32 %v1611_v8, %v775_v49 }
 0x1a0   :  { %842 = vst [vmem:[#allocation2] sm:$0xff] %v826_v37 }
 0x1a2   :  { %v688_v24 = vpop.f32.mrf.mxu2  ;;  %v801_v26 = vpop.f32.mrf.mxu3 }
 0x1a3   :  { %v802_v4 = vadd.f32 %v801_v26, %v688_v24  ;;  %v664_v55 = vpop.f32.mrf.mxu0  ;;  %v777_v10 = vpop.f32.mrf.mxu1 }
 0x1a4   :  { %v778_v39 = vadd.f32 %v777_v10, %v664_v55 }
 0x1a5   :  { %v835_v18 = vadd.f32 %v1611_v8, %v802_v4 }
 0x1a6   :  { %v827_v31 = vadd.f32 %v1611_v8, %v778_v39 }
 0x1a7   :  { %851 = vst [vmem:[#allocation2 + $0x48] sm:$0xff] %v835_v18 }
 0x1a8   :  { %843 = vst [vmem:[#allocation2 + $0x8] sm:$0xff] %v827_v31 }
 0x1ac   :  { %v667_v42 = vpop.f32.mrf.mxu0  ;;  %v780_v1 = vpop.f32.mrf.mxu1 }
 0x1ad   :  { %v781_v61 = vadd.f32 %v780_v1, %v667_v42 }
 0x1af   :  { %v828_v25 = vadd.f32 %v1611_v8, %v781_v61 }
 0x1b1   :  { %844 = vst [vmem:[#allocation2 + $0x10] sm:$0xff] %v828_v25  ;;  %v691_v28 = vpop.f32.mrf.mxu2  ;;  %v804_v16 = vpop.f32.mrf.mxu3 }
 0x1b2   :  { %v805_v22 = vadd.f32 %v804_v16, %v691_v28 }
 0x1b4   :  { %v836_v19 = vadd.f32 %v1611_v8, %v805_v22 }
 0x1b6   :  { %852 = vst [vmem:[#allocation2 + $0x50] sm:$0xff] %v836_v19 }
 0x1b9   :  { %v694_v12 = vpop.f32.mrf.mxu2  ;;  %v807_v13 = vpop.f32.mrf.mxu3 }
 0x1ba   :  { %v808_v59 = vadd.f32 %v807_v13, %v694_v12 }
 0x1bb   :  { %v670_v33 = vpop.f32.mrf.mxu0  ;;  %v783_v34 = vpop.f32.mrf.mxu1 }
 0x1bc   :  { %v837_v51 = vadd.f32 %v1611_v8, %v808_v59  ;;  %v784_v20 = vadd.f32 %v783_v34, %v670_v33 }
 0x1be   :  { %853 = vst [vmem:[#allocation2 + $0x58] sm:$0xff] %v837_v51  ;;  %v829_v48 = vadd.f32 %v1611_v8, %v784_v20 }
 0x1c0   :  { %845 = vst [vmem:[#allocation2 + $0x18] sm:$0xff] %v829_v48 }
 0x1c2   :  { %v697_v57 = vpop.f32.mrf.mxu2  ;;  %v810_v60 = vpop.f32.mrf.mxu3 }
 0x1c3   :  { %v811_v52 = vadd.f32 %v810_v60, %v697_v57  ;;  %v673_v9 = vpop.f32.mrf.mxu0  ;;  %v786_v3 = vpop.f32.mrf.mxu1 }
 0x1c4   :  { %v787_v32 = vadd.f32 %v786_v3, %v673_v9 }
 0x1c5   :  { %v838_v47 = vadd.f32 %v1611_v8, %v811_v52 }
 0x1c6   :  { %v830_v6 = vadd.f32 %v1611_v8, %v787_v32 }
 0x1c7   :  { %854 = vst [vmem:[#allocation2 + $0x60] sm:$0xff] %v838_v47 }
 0x1c8   :  { %846 = vst [vmem:[#allocation2 + $0x20] sm:$0xff] %v830_v6 }
 0x1cc   :  { %v676_v14 = vpop.f32.mrf.mxu0  ;;  %v789_v36 = vpop.f32.mrf.mxu1 }
 0x1cd   :  { %v790_v62 = vadd.f32 %v789_v36, %v676_v14 }
 0x1cf   :  { %v831_v44 = vadd.f32 %v1611_v8, %v790_v62 }
 0x1d1   :  { %847 = vst [vmem:[#allocation2 + $0x28] sm:$0xff] %v831_v44  ;;  %v700_v38 = vpop.f32.mrf.mxu2  ;;  %v813_v53 = vpop.f32.mrf.mxu3 }
 0x1d2   :  { %v814_v5 = vadd.f32 %v813_v53, %v700_v38 }
 0x1d4   :  { %v839_v27 = vadd.f32 %v1611_v8, %v814_v5 }
 0x1d6   :  { %855 = vst [vmem:[#allocation2 + $0x68] sm:$0xff] %v839_v27 }
 0x1d9   :  { %v703_v63 = vpop.f32.mrf.mxu2  ;;  %v816_v21 = vpop.f32.mrf.mxu3 }
 0x1da   :  { %v817_v30 = vadd.f32 %v816_v21, %v703_v63 }
 0x1db   :  { %v679_v43 = vpop.f32.mrf.mxu0  ;;  %v792_v15 = vpop.f32.mrf.mxu1 }
 0x1dc   :  { %v840_v54 = vadd.f32 %v1611_v8, %v817_v30  ;;  %v793_v35 = vadd.f32 %v792_v15, %v679_v43 }
 0x1de   :  { %856 = vst [vmem:[#allocation2 + $0x70] sm:$0xff] %v840_v54  ;;  %v832_v46 = vadd.f32 %v1611_v8, %v793_v35 }
 0x1e0   :  { %848 = vst [vmem:[#allocation2 + $0x30] sm:$0xff] %v832_v46 }
 0x1e2   :  { %v706_v29 = vpop.f32.mrf.mxu2  ;;  %v819_v11 = vpop.f32.mrf.mxu3 }
 0x1e3   :  { %v820_v40 = vadd.f32 %v819_v11, %v706_v29  ;;  %v682_v2 = vpop.f32.mrf.mxu0  ;;  %v795_v23 = vpop.f32.mrf.mxu1 }
 0x1e4   :  { %v796_v50 = vadd.f32 %v795_v23, %v682_v2 }
 0x1e5   :  { %v841_v45 = vadd.f32 %v1611_v8, %v820_v40 }
 0x1e6   :  { %v833_v7 = vadd.f32 %v1611_v8, %v796_v50 }
 0x1e7   :  { %857 = vst [vmem:[#allocation2 + $0x78] sm:$0xff] %v841_v45 }
 0x1e8   :  { %849 = vst [vmem:[#allocation2 + $0x38] sm:$0xff] %v833_v7 }
 0x1e9   :  { %870 = dma.vmem_to_hbm [thread:$0]  %s863_s5, 2048, %s865_s8, [#allocation3], %s1003_s9, %s1003_s9, %s1004_s10  }
 0x1ea   :  { %1000 = dma.done.wait [#allocation3], 2048  }
 0x1eb   :  { %1001 = vsyncadd [#allocation3], 4294965248 }
 0x1ec   :  { %875 = vsyncpa [#allocation3], 1 }

</bundles_post_ra>
